<compile_context>
chip_gen: v6e
topology: v6e:2x2x1
jax: 0.10.0
libtpu: 0.0.40
codegen_flags: <defaults>
</compile_context>

<pallas_src>
import functools

import jax
import jax.numpy as jnp
from jax import lax
from jax.experimental import pallas as pl
from jax.experimental.pallas import tpu as pltpu

_LANES = 128


def _angular_error_kernel(pred_ref, gaze_ref, out_ref, acc_ref, *,
                          inv_n, n_valid, tile_k, mask_tail):
    k = pl.program_id(1)

    @pl.when(k == 0)
    def _():
        acc_ref[...] = jnp.zeros_like(acc_ref)

    d = pred_ref[...].astype(jnp.float32) - gaze_ref[...].astype(jnp.float32)

    if mask_tail:
        # Zero out columns past N on the (padded) tail block.
        col = lax.broadcasted_iota(jnp.int32, d.shape, 1) + k * tile_k
        d = jnp.where(col < n_valid, d, 0.0)

    sq = d * d

    # Fold 128-wide lane strips into a (tb, 128) running sum: pure VPU adds in
    # the hot loop; the cross-lane reduce is deferred to the epilogue.
    partial = sq[:, 0:_LANES]
    for i in range(1, tile_k // _LANES):
        partial = partial + sq[:, i * _LANES:(i + 1) * _LANES]
    acc_ref[...] += partial

    @pl.when(k == pl.num_programs(1) - 1)
    def _():
        out_ref[...] = (jnp.sum(acc_ref[...], axis=1, keepdims=True)
                        * inv_n).astype(out_ref.dtype)


def _pick_batch_tile(B):
    # Prefer a multiple-of-8 sublane tile that divides B; otherwise a
    # full-extent batch block (always legal for the (8,128) rule).
    if B % 8 == 0:
        for cand in (64, 32, 16, 8):
            if B % cand == 0:
                return cand
    return B


def _round_up(x, m):
    return ((x + m - 1) // m) * m


def angular_error(gaze_pred, gaze, *, max_tile_k=8192):
    assert gaze_pred.shape == gaze.shape
    B = gaze_pred.shape[0]
    N = 1
    for d in gaze_pred.shape[1:]:
        N *= d

    pred2d = gaze_pred.reshape(B, N)
    gaze2d = gaze.reshape(B, N)

    tb = _pick_batch_tile(B)

    # Cap a single input block at ~2 MiB so 2 inputs x 2 buffers stays <= 8 MiB
    # (comfortable on v5e's 16 MiB scoped default and v7x's 64 MiB physical).
    bytes_per_block_budget = 2 * 1024 * 1024
    tk_budget = max(_LANES,
                    (bytes_per_block_budget // (tb * 4)) // _LANES * _LANES)
    tk = min(max_tile_k, tk_budget, _round_up(N, _LANES))
    tk = max(_LANES, (tk // _LANES) * _LANES)

    grid_b = B // tb
    grid_k = pl.cdiv(N, tk)
    mask_tail = (N % tk) != 0

    kernel = functools.partial(
        _angular_error_kernel,
        inv_n=1.0 / float(N), n_valid=N, tile_k=tk, mask_tail=mask_tail)

    out = pl.pallas_call(
        kernel,
        out_shape=jax.ShapeDtypeStruct((B, 1), jnp.float32),
        grid_spec=pltpu.PrefetchScalarGridSpec(
            num_scalar_prefetch=0,
            grid=(grid_b, grid_k),
            in_specs=[
                pl.BlockSpec((tb, tk), lambda b, k: (b, k)),
                pl.BlockSpec((tb, tk), lambda b, k: (b, k)),
            ],
            out_specs=pl.BlockSpec((tb, 1), lambda b, k: (b, 0)),
            scratch_shapes=[pltpu.VMEM((tb, _LANES), jnp.float32)],
        ),
        compiler_params=pltpu.CompilerParams(
            dimension_semantics=("parallel", "arbitrary"),
            vmem_limit_bytes=32 * 1024 * 1024,
        ),
    )(pred2d, gaze2d)

    return out.reshape(B)


if __name__ == "__main__":
    key = jax.random.PRNGKey(0)
    k1, k2 = jax.random.split(key)

    B, C, H, W = 2, 4, 16, 16
    gaze_pred = jax.random.normal(k1, (B, C, H, W), dtype=jnp.float32)
    gaze = jax.random.normal(k2, (B, C, H, W), dtype=jnp.float32)

    loss = angular_error(gaze_pred, gaze)
    loss = jax.block_until_ready(loss)

    # Reference check (pure JAX, mirrors the PyTorch forward).
    ref = jnp.mean((gaze_pred - gaze) ** 2, axis=(1, 2, 3))
    assert loss.shape == (B,)
    assert jnp.allclose(loss, ref, rtol=1e-5, atol=1e-6)

    print("KERNEL_OK")
</pallas_src>

<mosaic_0001>
module attributes {stable_mosaic.version = 11 : i64} {
  func.func @_angular_error_kernel(%arg0: i32, %arg1: i32, %arg2: memref<2x1024xf32, #tpu.memory_space<vmem>>, %arg3: memref<2x1024xf32, #tpu.memory_space<vmem>>, %arg4: memref<2x1xf32, #tpu.memory_space<vmem>>, %arg5: memref<2x128xf32, #tpu.memory_space<vmem>>) attributes {dimension_semantics = [#tpu.dimension_semantics<parallel>, #tpu.dimension_semantics<arbitrary>], iteration_bounds = array<i64: 1, 1>, scalar_prefetch = 0 : i64, scratch_operands = 1 : i64, tpu.core_type = #tpu.core_type<tc>, window_params = [{transform_indices = @transform_0, window_bounds = array<i64: 2, 1024>}, {transform_indices = @transform_1, window_bounds = array<i64: 2, 1024>}, {transform_indices = @transform_2, window_bounds = array<i64: 2, 1>}]} {
    %c0_i32 = arith.constant 0 : i32
    %0 = arith.cmpi eq, %arg1, %c0_i32 : i32
    %1 = arith.extui %0 : i1 to i32
    %c0_i32_0 = arith.constant 0 : i32
    %2 = arith.cmpi ne, %1, %c0_i32_0 : i32
    scf.if %2 {
      %cst = arith.constant 0.000000e+00 : f32
      %28 = vector.broadcast %cst : f32 to vector<2x128xf32>
      %c0_10 = arith.constant 0 : index
      %c0_11 = arith.constant 0 : index
      %29 = vector.load %arg5[%c0_10, %c0_11] : memref<2x128xf32, #tpu.memory_space<vmem>>, vector<2x128xf32>
      tpu.vector_store %arg5[%c0_10, %c0_11], %28 {strides = array<i32>} : memref<2x128xf32, #tpu.memory_space<vmem>>, vector<2x128xf32>,
    } else {
    }
    %c0 = arith.constant 0 : index
    %c0_1 = arith.constant 0 : index
    %3 = vector.load %arg2[%c0, %c0_1] : memref<2x1024xf32, #tpu.memory_space<vmem>>, vector<2x1024xf32>
    %c0_2 = arith.constant 0 : index
    %c0_3 = arith.constant 0 : index
    %4 = vector.load %arg3[%c0_2, %c0_3] : memref<2x1024xf32, #tpu.memory_space<vmem>>, vector<2x1024xf32>
    %5 = arith.subf %3, %4 : vector<2x1024xf32>
    %6 = arith.mulf %5, %5 : vector<2x1024xf32>
    %7 = vector.extract_strided_slice %6 {offsets = [0, 0], sizes = [2, 128], strides = [1, 1]} : vector<2x1024xf32> to vector<2x128xf32>
    %8 = vector.extract_strided_slice %6 {offsets = [0, 128], sizes = [2, 128], strides = [1, 1]} : vector<2x1024xf32> to vector<2x128xf32>
    %9 = arith.addf %7, %8 : vector<2x128xf32>
    %10 = vector.extract_strided_slice %6 {offsets = [0, 256], sizes = [2, 128], strides = [1, 1]} : vector<2x1024xf32> to vector<2x128xf32>
    %11 = arith.addf %9, %10 : vector<2x128xf32>
    %12 = vector.extract_strided_slice %6 {offsets = [0, 384], sizes = [2, 128], strides = [1, 1]} : vector<2x1024xf32> to vector<2x128xf32>
    %13 = arith.addf %11, %12 : vector<2x128xf32>
    %14 = vector.extract_strided_slice %6 {offsets = [0, 512], sizes = [2, 128], strides = [1, 1]} : vector<2x1024xf32> to vector<2x128xf32>
    %15 = arith.addf %13, %14 : vector<2x128xf32>
    %16 = vector.extract_strided_slice %6 {offsets = [0, 640], sizes = [2, 128], strides = [1, 1]} : vector<2x1024xf32> to vector<2x128xf32>
    %17 = arith.addf %15, %16 : vector<2x128xf32>
    %18 = vector.extract_strided_slice %6 {offsets = [0, 768], sizes = [2, 128], strides = [1, 1]} : vector<2x1024xf32> to vector<2x128xf32>
    %19 = arith.addf %17, %18 : vector<2x128xf32>
    %20 = vector.extract_strided_slice %6 {offsets = [0, 896], sizes = [2, 128], strides = [1, 1]} : vector<2x1024xf32> to vector<2x128xf32>
    %21 = arith.addf %19, %20 : vector<2x128xf32>
    %c0_4 = arith.constant 0 : index
    %c0_5 = arith.constant 0 : index
    %22 = vector.load %arg5[%c0_4, %c0_5] : memref<2x128xf32, #tpu.memory_space<vmem>>, vector<2x128xf32>
    %23 = arith.addf %22, %21 : vector<2x128xf32>
    %c0_6 = arith.constant 0 : index
    %c0_7 = arith.constant 0 : index
    %24 = vector.load %arg5[%c0_6, %c0_7] : memref<2x128xf32, #tpu.memory_space<vmem>>, vector<2x128xf32>
    tpu.vector_store %arg5[%c0_6, %c0_7], %23 {strides = array<i32>} : memref<2x128xf32, #tpu.memory_space<vmem>>, vector<2x128xf32>,
    %c0_i32_8 = arith.constant 0 : i32
    %25 = arith.cmpi eq, %arg1, %c0_i32_8 : i32
    %26 = arith.extui %25 : i1 to i32
    %c0_i32_9 = arith.constant 0 : i32
    %27 = arith.cmpi ne, %26, %c0_i32_9 : i32
    scf.if %27 {
      %c0_10 = arith.constant 0 : index
      %c0_11 = arith.constant 0 : index
      %28 = vector.load %arg5[%c0_10, %c0_11] : memref<2x128xf32, #tpu.memory_space<vmem>>, vector<2x128xf32>
      %cst = arith.constant dense<0.000000e+00> : vector<2xf32>
      %29 = vector.multi_reduction <add>, %28, %cst [1] : vector<2x128xf32> to vector<2xf32>
      %30 = vector.shape_cast %29 : vector<2xf32> to vector<2x1xf32>
      %cst_12 = arith.constant 9.765625E-4 : f32
      %31 = vector.broadcast %cst_12 : f32 to vector<2x1xf32>
      %32 = arith.mulf %30, %31 : vector<2x1xf32>
      %c0_13 = arith.constant 0 : index
      %c0_14 = arith.constant 0 : index
      %33 = vector.load %arg4[%c0_13, %c0_14] : memref<2x1xf32, #tpu.memory_space<vmem>>, vector<2x1xf32>
      tpu.vector_store %arg4[%c0_13, %c0_14], %32 {strides = array<i32>} : memref<2x1xf32, #tpu.memory_space<vmem>>, vector<2x1xf32>,
    } else {
    }
    return
  }
  func.func @transform_0(%arg0: i32, %arg1: i32) -> (i32, i32) {
    %c0_i32 = arith.constant 0 : i32
    return %arg0, %arg1 : i32, i32
  }
  func.func @transform_1(%arg0: i32, %arg1: i32) -> (i32, i32) {
    %c0_i32 = arith.constant 0 : i32
    return %arg0, %arg1 : i32, i32
  }
  func.func @transform_2(%arg0: i32, %arg1: i32) -> (i32, i32) {
    %c0_i32 = arith.constant 0 : i32
    %c0_i32_0 = arith.constant 0 : i32
    return %arg0, %c0_i32 : i32, i32
  }
}

</mosaic_0001>

<bundles_post_ra>
// kernel: tpu_custom_call.1
= control target key start
LH: loop header
LB: loop body
LE: loop exit
PB: predicated region body
PF: predicated region fallthrough
CT: control target
= control target key end

     0   :  { %7 = vsyncpa [#allocation4], 0  ;;  %s163_s0 = inlined_call_operand.hbm [shape: f32[2,1024], index: 0, kind: input, shape index: {}]   ;;  %s164_s1 = inlined_call_operand.hbm [shape: f32[2,1024], index: 1, kind: input, shape index: {}]   ;;  %s165_s2 = inlined_call_operand.vmem [shape: f32[2,1], index: 2, kind: output, shape index: {}]  }
   0x1   :  { %8 = vsyncpa [#allocation6], 0  ;;  %s136_s9 = smov [#allocation3]   ;;  %s137_s11 = smov [#allocation5]  }
   0x2   :  { %s15_s10 = sshll.u32 %s136_s9, 4  ;;  %s25_s12 = sshll.u32 %s137_s11, 4  ;;  %s16_s10 = int_to_ptr.vmem [resolvable:$true] %s15_s10  ;;  %s26_s12 = int_to_ptr.vmem [resolvable:$true] %s25_s12 }
   0x3   :  { %s100_s13 = scalar_lea.vmem %s16_s10, 256  ;;  %p105_p1 = scmp.lt.s32.totalorder %s16_s10, %s16_s10 }
   0x4   :  { %p101_p0 = scmp.ne.s32.totalorder %s16_s10, %s100_s13  ;;  %p106_p2 = scmp.lt.s32.totalorder %s100_s13, %s100_s13 }
   0x6   :  { %p107_p3 = por %p106_p2, %p105_p1 }
   0x8   :  { %p108_p4 = pnand %p107_p3, %p101_p0 }
   0xa   :  { %111 = shalt.err (!%p108_p4)
}
   0xb   :  { %18 = dma.hbm_to_vmem [thread:$0]  %s163_s0, 256, %s16_s10, [#allocation4]  }
   0xc   :  { %s120_s16 = scalar_lea.vmem %s26_s12, 256  ;;  %p125_p6 = scmp.lt.s32.totalorder %s26_s12, %s26_s12 }
   0xd   :  { %p121_p5 = scmp.ne.s32.totalorder %s26_s12, %s120_s16  ;;  %p126_p7 = scmp.lt.s32.totalorder %s120_s16, %s120_s16 }
   0xf   :  { %p127_p8 = por %p126_p7, %p125_p6 }
  0x11   :  { %p128_p9 = pnand %p127_p8, %p121_p5 }
  0x13   :  { %131 = shalt.err (!%p128_p9)
}
  0x14   :  { %28 = dma.hbm_to_vmem [thread:$0]  %s164_s1, 256, %s26_s12, [#allocation6]  }
  0x15   :  { %132 = dma.done.wait [#allocation4], 256  }
  0x16   :  { %133 = vsyncadd [#allocation4], 4294967040 }
  0x17   :  { %134 = dma.done.wait [#allocation6], 256  }
  0x18   :  { %135 = vsyncadd [#allocation6], 4294967040  ;;  %v138_v0 = vmov 0.0   ;;  %v40_v1 = vld [vmem:[#allocation3] sm:$0xff]  ;;  %v41_v2 = vld [vmem:[#allocation3 + $0x8] sm:$0xff]  ;;  %vm76_vm0 = vcmask 1041408  }
  0x19   :  { %39 = vst [vmem:[#allocation2] sm:$0x3] %v138_v0  ;;  %v42_v3 = vld [vmem:[#allocation5] sm:$0xff]  ;;  %v43_v4 = vld [vmem:[#allocation5 + $0x8] sm:$0xff]  ;;  %vm81_vm1 = vcmask 1024  }
  0x1a   :  { %v44_v5 = vsub.f32 %v40_v1, %v42_v3  ;;  %v45_v6 = vsub.f32 %v41_v2, %v43_v4 }
  0x1c   :  { %v46_v7 = vmul.f32 %v44_v5, %v44_v5  ;;  %v47_v10 = vmul.f32 %v45_v6, %v45_v6 }
  0x1e   :  { %v49_v8 = vrot.slane %v46_v7, 2  ;;  %v52_v9 = vrot.slane %v46_v7, 4  ;;  %v55_v12 = vrot.slane %v46_v7, 6  ;;  %v60_v15 = vrot.slane %v47_v10, 2 }
  0x1f   :  { %v63_v17 = vrot.slane %v47_v10, 4  ;;  %v66_v19 = vrot.slane %v47_v10, 6 }
  0x20   :  { %v51_v11 = vadd.f32 %v49_v8, %v46_v7  ;;  %v69_v21 = vld [vmem:[#allocation2] sm:$0x3] }
  0x22   :  { %v54_v13 = vadd.f32 %v52_v9, %v51_v11 }
  0x24   :  { %v57_v14 = vadd.f32 %v55_v12, %v54_v13 }
  0x26   :  { %v58_v16 = vadd.f32 %v57_v14, %v47_v10 }
  0x28   :  { %v62_v18 = vadd.f32 %v60_v15, %v58_v16 }
  0x2a   :  { %v65_v20 = vadd.f32 %v63_v17, %v62_v18 }
  0x2c   :  { %v68_v22 = vadd.f32 %v66_v19, %v65_v20 }
  0x2e   :  { %v70_v23 = vadd.f32 %v69_v21, %v68_v22 }
  0x30   :  { %71 = vst [vmem:[#allocation2] sm:$0x3] %v70_v23 }
  0x37   :  { %v75_v24 = vld [vmem:[#allocation2] sm:$0x3] }
  0x38   :  { %v77_v25 = vsel %vm76_vm0, %v75_v24, 0.0 }
  0x39   :  { %78 = vadd.xlane.f32.xlu0 %v77_v25 }
  0xc2   :  { %v79_v26 = vpop.xlane.xlu0 %78 }
  0xc3   :  { %v80_v27 = vmul.f32 0.0009765625, %v79_v26 }
  0xc5   :  { %82 = vst.msk [vmem:[%s165_s2] sm:$0x3] %vm81_vm1, %v80_v27 }
  0xc6   :  { %87 = vsyncpa [#allocation4], 1 }
  0xc7   :  { %88 = vsyncpa [#allocation6], 1 }

</bundles_post_ra>
